<compile_context>
chip_gen: v7x
topology: tpu7x:2x2x1
jax: 0.10.0
libtpu: 0.0.40
codegen_flags: <defaults>
</compile_context>

<pallas_src>
import math

import jax
import jax.numpy as jnp
from jax.experimental import pallas as pl
from jax.experimental.pallas import tpu as pltpu

_LANE = 128
_SUBLANE_F32 = 8
_SUBLANE_BF16 = 16
_INV_SQRT2 = 0.7071067811865476
_SQRT_2_OVER_PI = 0.7978845608028654
_GELU_TANH_C = 0.044715

# Conservative resident-weight budget per fused call: leaves room for the
# double-buffered activation/output tiles and f32 scratch inside v7x's 64 MiB.
_DEFAULT_WEIGHT_BUDGET = 40 << 20


def _round_up(x, m):
    return ((x + m - 1) // m) * m


def _make_fused_kernel(num_layers, scale_after, use_bf16, approximate):
    """Kernel applying `num_layers` FF layers to one resident batch tile."""

    def gelu(y):
        if approximate:
            # tanh GELU -> EUP slot instead of a long erf polynomial on the VALU.
            inner = jnp.float32(_SQRT_2_OVER_PI) * (y + jnp.float32(_GELU_TANH_C) * y * y * y)
            return 0.5 * y * (1.0 + jnp.tanh(inner))
        # Exact (erf-based) GELU, matching torch.nn.GELU() default.
        return 0.5 * y * (1.0 + jax.lax.erf(y * jnp.float32(_INV_SQRT2)))

    def kernel(*refs):
        # refs = (x_ref, w0, b0, w1, b1, ..., o_ref)
        # weights are pre-transposed [d_in_pad, d_out_pad], biases [1, d_out_pad],
        # both zero-padded (exact: padded lanes stay 0, do not perturb norms/dots).
        x_ref = refs[0]
        o_ref = refs[-1]
        h = x_ref[...].astype(jnp.float32)
        for l in range(num_layers):                       # static unrolled layer loop
            w = refs[1 + 2 * l][...]
            b = refs[2 + 2 * l][...]
            norm = jnp.sqrt(jnp.sum(h * h, axis=-1, keepdims=True)) + jnp.float32(1e-4)
            if approximate:
                inv = pl.reciprocal(norm, approx=True)    # EUP, ~free
            else:
                inv = 1.0 / norm
            # Apply the [tile, 1] scale on the narrower side of the matmul.
            lhs = h if scale_after[l] else h * inv
            if use_bf16:
                y = jnp.dot(lhs.astype(jnp.bfloat16), w,
                            preferred_element_type=jnp.float32)
            else:
                y = jnp.dot(lhs, w, preferred_element_type=jnp.float32,
                            precision=jax.lax.Precision.HIGHEST)
            if scale_after[l]:
                y = y * inv
            h = gelu(y + b)
        o_ref[...] = h.astype(o_ref.dtype)

    return kernel


def _fused_group_call(x_pad, wts, biases, tile, *, use_bf16, approximate):
    """One pallas_call fusing a consecutive group of layers; weights resident."""
    n_pad, d_in_pad = x_pad.shape
    num_layers = len(wts)
    d_out_pad = wts[-1].shape[1]
    # post-scale when the layer contracts (d_out_pad < d_in_pad), else pre-scale.
    scale_after = tuple(int(w.shape[1]) < int(w.shape[0]) for w in wts)

    in_specs = [pl.BlockSpec((tile, d_in_pad), lambda i: (i, 0))]   # activation tile
    operands = [x_pad]
    for w, b in zip(wts, biases):
        di, do = w.shape
        # Grid-invariant operands: single-buffered, DMA'd once, resident in VMEM.
        in_specs.append(pl.BlockSpec((di, do), lambda i: (0, 0),
                                     pipeline_mode=pl.Buffered(1)))
        in_specs.append(pl.BlockSpec((1, do), lambda i: (0, 0),
                                     pipeline_mode=pl.Buffered(1)))
        operands.extend([w, b])

    # Explicit VMEM budget (scoped default is only 16/32 MiB):
    #   weights/biases (x1 buffer) + input tile (x2) + output tile (x2) + f32 scratch.
    weight_bytes = sum(int(w.size) * w.dtype.itemsize for w in wts) \
                 + sum(int(b.size) * b.dtype.itemsize for b in biases)
    max_width = max(d_in_pad, max(int(w.shape[1]) for w in wts))
    tile_bytes = 2 * tile * d_in_pad * x_pad.dtype.itemsize \
               + 2 * tile * d_out_pad * x_pad.dtype.itemsize
    scratch_bytes = 4 * tile * max_width * 4
    vmem_limit = int(1.25 * (weight_bytes + tile_bytes + scratch_bytes)) + (4 << 20)
    vmem_limit = max(32 << 20, min(vmem_limit, 128 << 20))

    flops = 2 * n_pad * sum(int(w.shape[0]) * int(w.shape[1]) for w in wts)
    transcendentals = n_pad * sum(int(w.shape[1]) for w in wts)
    bytes_accessed = (int(x_pad.size) * x_pad.dtype.itemsize + weight_bytes
                      + n_pad * d_out_pad * x_pad.dtype.itemsize)

    return pl.pallas_call(
        _make_fused_kernel(num_layers, scale_after, use_bf16, approximate),
        out_shape=jax.ShapeDtypeStruct((n_pad, d_out_pad), x_pad.dtype),
        grid_spec=pltpu.PrefetchScalarGridSpec(
            num_scalar_prefetch=0,
            grid=(n_pad // tile,),
            in_specs=in_specs,
            out_specs=pl.BlockSpec((tile, d_out_pad), lambda i: (i, 0)),
        ),
        compiler_params=pltpu.CompilerParams(
            dimension_semantics=("parallel",),
            vmem_limit_bytes=vmem_limit),
        cost_estimate=pl.CostEstimate(
            flops=flops,
            transcendentals=transcendentals,
            bytes_accessed=bytes_accessed),
    )(*operands)


def ff_network_forward(x, wts, biases, *, d_out, tile_m=512, use_bf16=False,
                       approximate=False, weight_budget=_DEFAULT_WEIGHT_BUDGET):
    """Eval-mode forward over all FF layers (fused groups of pallas_calls).

    x:      [n, d_in] activations.
    wts:    tuple of pre-transposed, zero-padded weights [d_in_pad_l, d_out_pad_l].
    biases: tuple of zero-padded biases [1, d_out_pad_l] (f32).
    """
    n, d_in = x.shape
    d_in_pad = wts[0].shape[0]

    # Lane-dense input: pad features to a multiple of 128 with zeros (exact).
    if d_in_pad != d_in:
        x = jnp.pad(x, ((0, 0), (0, d_in_pad - d_in)))

    # Tile selection: minimize padded rows, keep >= 2 grid steps (v7x: 2 TCs),
    # bf16 LHS wants 16-row sublane packing.
    sublane = _SUBLANE_BF16 if use_bf16 else _SUBLANE_F32
    min_steps = 2 if n >= 2 * sublane else 1
    steps = max(min_steps, pl.cdiv(n, tile_m))
    tile = _round_up(pl.cdiv(n, steps), sublane)
    steps = max(min_steps, pl.cdiv(n, tile))
    n_pad = steps * tile
    if n_pad != n:
        x = jnp.pad(x, ((0, n_pad - n), (0, 0)))

    # Group consecutive layers so each fused call's resident weights fit the budget.
    groups, cur, cur_bytes = [], [], 0
    for w, b in zip(wts, biases):
        nbytes = int(w.size) * w.dtype.itemsize + int(b.size) * b.dtype.itemsize
        if cur and cur_bytes + nbytes > weight_budget:
            groups.append(cur)
            cur, cur_bytes = [], 0
        cur.append((w, b))
        cur_bytes += nbytes
    if cur:
        groups.append(cur)

    h = x
    for g in groups:
        gw = tuple(w for w, _ in g)
        gb = tuple(b for _, b in g)
        h = _fused_group_call(h, gw, gb, tile,
                              use_bf16=use_bf16, approximate=approximate)
    return h[:n, :d_out]


class FFNetworkBatchedPallas:
    """Pallas equivalent of FFNetworkBatched (eval-mode forward)."""

    def __init__(self, dims, key, *, tile_m=512, use_bf16=False, approximate=False,
                 weight_budget=_DEFAULT_WEIGHT_BUDGET):
        assert len(dims) >= 1, "len(dims) should be greater than equal to 1"
        self.dims = list(dims)
        self.tile_m = tile_m
        self.use_bf16 = use_bf16
        self.approximate = approximate
        self.weight_budget = weight_budget
        self.params = []     # PyTorch-layout (w [d_out, d_in], b [d_out]) for reference
        wts, biases = [], []
        w_dtype = jnp.bfloat16 if use_bf16 else jnp.float32
        for d in range(len(dims) - 1):
            key, kw, kb = jax.random.split(key, 3)
            bound = 1.0 / math.sqrt(dims[d])   # torch.nn.Linear default init range
            w = jax.random.uniform(kw, (dims[d + 1], dims[d]),
                                   jnp.float32, -bound, bound)
            b = jax.random.uniform(kb, (dims[d + 1],),
                                   jnp.float32, -bound, bound)
            self.params.append((w, b))
            # Pre-transpose + zero-pad ONCE (lane-dense, exact under padding).
            di_pad = _round_up(dims[d], _LANE)
            do_pad = _round_up(dims[d + 1], _LANE)
            wt_pad = jnp.zeros((di_pad, do_pad), jnp.float32)
            wt_pad = wt_pad.at[:dims[d], :dims[d + 1]].set(w.T)
            b_pad = jnp.zeros((1, do_pad), jnp.float32)
            b_pad = b_pad.at[0, :dims[d + 1]].set(b)
            wts.append(wt_pad.astype(w_dtype))
            biases.append(b_pad)
        self._wts = tuple(wts)
        self._biases = tuple(biases)
        self._fwd = jax.jit(
            ff_network_forward,
            static_argnames=("d_out", "tile_m", "use_bf16", "approximate",
                             "weight_budget"))

    def __len__(self):
        return len(self.params)

    def __call__(self, x):
        # eval path: `for module in self: input = module(input)` — fused here.
        if not self.params:
            return x
        return self._fwd(x, self._wts, self._biases,
                         d_out=self.dims[-1], tile_m=self.tile_m,
                         use_bf16=self.use_bf16, approximate=self.approximate,
                         weight_budget=self.weight_budget)


def _reference(x, params):
    """Pure-JAX reference of the same forward (for correctness checks)."""
    for w, b in params:
        norm = jnp.sqrt(jnp.sum(x * x, axis=-1, keepdims=True))
        x_dir = x / (norm + 1e-4)
        y = x_dir @ w.T + b
        x = jax.nn.gelu(y, approximate=False)
    return x


if __name__ == "__main__":
    key = jax.random.PRNGKey(0)
    k_model, k_data = jax.random.split(key)

    dims = [32, 64, 128]          # FFNetworkBatched(dims) -> 2 FFLayers
    batch = 8

    # 1) Exact f32 path, tiny batch (single grid step).
    model = FFNetworkBatchedPallas(dims, k_model)
    x = jax.random.normal(k_data, (batch, dims[0]), dtype=jnp.float32)
    out = jax.block_until_ready(model(x))
    assert out.shape == (batch, dims[-1]), out.shape
    ref = _reference(x, model.params)
    assert jnp.allclose(out, ref, atol=1e-4, rtol=1e-4), \
        float(jnp.max(jnp.abs(out - ref)))

    # 2) Row padding + multi-step grid + forced layer grouping (2 fused calls).
    model2 = FFNetworkBatchedPallas(dims, k_model, tile_m=64, weight_budget=1 << 16)
    x2 = jax.random.normal(jax.random.PRNGKey(1), (200, dims[0]), dtype=jnp.float32)
    out2 = jax.block_until_ready(model2(x2))
    assert out2.shape == (200, dims[-1]), out2.shape
    ref2 = _reference(x2, model2.params)
    assert jnp.allclose(out2, ref2, atol=1e-4, rtol=1e-4), \
        float(jnp.max(jnp.abs(out2 - ref2)))

    # 3) Fast path: bf16 MXU + tanh GELU + approx reciprocal (looser tolerance).
    model3 = FFNetworkBatchedPallas(dims, k_model, use_bf16=True, approximate=True)
    x3 = jax.random.normal(jax.random.PRNGKey(2), (64, dims[0]), dtype=jnp.float32)
    out3 = jax.block_until_ready(model3(x3))
    assert out3.shape == (64, dims[-1]), out3.shape
    ref3 = _reference(x3, model3.params)
    assert jnp.allclose(out3, ref3, atol=2e-2, rtol=2e-2), \
        float(jnp.max(jnp.abs(out3 - ref3)))

    print("KERNEL_OK")
</pallas_src>

<mosaic_0001>
module attributes {stable_mosaic.version = 11 : i64} {
  func.func @kernel(%arg0: i32, %arg1: memref<8x128xf32, #tpu.memory_space<vmem>>, %arg2: memref<128x128xf32, #tpu.memory_space<vmem>>, %arg3: memref<1x128xf32, #tpu.memory_space<vmem>>, %arg4: memref<128x128xf32, #tpu.memory_space<vmem>>, %arg5: memref<1x128xf32, #tpu.memory_space<vmem>>, %arg6: memref<8x128xf32, #tpu.memory_space<vmem>>) attributes {dimension_semantics = [#tpu.dimension_semantics<parallel>], iteration_bounds = array<i64: 1>, scalar_prefetch = 0 : i64, scratch_operands = 0 : i64, tpu.core_type = #tpu.core_type<tc>, window_params = [{transform_indices = @transform_0, window_bounds = array<i64: 8, 128>}, {pipeline_mode = #tpu.pipeline_mode<synchronous>, transform_indices = @transform_1, window_bounds = array<i64: 128, 128>}, {pipeline_mode = #tpu.pipeline_mode<synchronous>, transform_indices = @transform_2, window_bounds = array<i64: 1, 128>}, {pipeline_mode = #tpu.pipeline_mode<synchronous>, transform_indices = @transform_3, window_bounds = array<i64: 128, 128>}, {pipeline_mode = #tpu.pipeline_mode<synchronous>, transform_indices = @transform_4, window_bounds = array<i64: 1, 128>}, {transform_indices = @transform_5, window_bounds = array<i64: 8, 128>}]} {
    %c0 = arith.constant 0 : index
    %c0_0 = arith.constant 0 : index
    %0 = vector.load %arg1[%c0, %c0_0] : memref<8x128xf32, #tpu.memory_space<vmem>>, vector<8x128xf32>
    %c0_1 = arith.constant 0 : index
    %c0_2 = arith.constant 0 : index
    %1 = vector.load %arg2[%c0_1, %c0_2] : memref<128x128xf32, #tpu.memory_space<vmem>>, vector<128x128xf32>
    %c0_3 = arith.constant 0 : index
    %c0_4 = arith.constant 0 : index
    %2 = vector.load %arg3[%c0_3, %c0_4] : memref<1x128xf32, #tpu.memory_space<vmem>>, vector<1x128xf32>
    %3 = arith.mulf %0, %0 : vector<8x128xf32>
    %cst = arith.constant dense<0.000000e+00> : vector<8xf32>
    %4 = vector.multi_reduction <add>, %3, %cst [1] : vector<8x128xf32> to vector<8xf32>
    %5 = vector.shape_cast %4 : vector<8xf32> to vector<8x1xf32>
    %6 = math.sqrt %5 : vector<8x1xf32>
    %cst_5 = arith.constant 9.99999974E-5 : f32
    %7 = vector.broadcast %cst_5 : f32 to vector<8x1xf32>
    %8 = arith.addf %6, %7 : vector<8x1xf32>
    %cst_6 = arith.constant 1.000000e+00 : f32
    %9 = vector.broadcast %cst_6 : f32 to vector<8x1xf32>
    %10 = arith.divf %9, %8 : vector<8x1xf32>
    %11 = vector.broadcast %10 : vector<8x1xf32> to vector<8x128xf32>
    %12 = arith.mulf %0, %11 : vector<8x128xf32>
    %cst_7 = arith.constant dense<0.000000e+00> : vector<8x128xf32>
    %13 = tpu.matmul %12, %1, %cst_7 {dimension_numbers = #tpu.dot_dimension_numbers<[1], [0], [0], [1], [0, 0, 1, 1], [], []>, precision = #tpu.contract_precision<fp32>} : vector<8x128xf32>, vector<128x128xf32>, vector<8x128xf32> -> vector<8x128xf32>
    %14 = vector.broadcast %2 : vector<1x128xf32> to vector<8x128xf32>
    %15 = arith.addf %13, %14 : vector<8x128xf32>
    %cst_8 = arith.constant 5.000000e-01 : f32
    %16 = vector.broadcast %cst_8 : f32 to vector<8x128xf32>
    %17 = arith.mulf %16, %15 : vector<8x128xf32>
    %cst_9 = arith.constant 0.707106769 : f32
    %18 = vector.broadcast %cst_9 : f32 to vector<8x128xf32>
    %19 = arith.mulf %15, %18 : vector<8x128xf32>
    %20 = math.erf %19 : vector<8x128xf32>
    %cst_10 = arith.constant 1.000000e+00 : f32
    %21 = vector.broadcast %cst_10 : f32 to vector<8x128xf32>
    %22 = arith.addf %21, %20 : vector<8x128xf32>
    %23 = arith.mulf %17, %22 : vector<8x128xf32>
    %c0_11 = arith.constant 0 : index
    %c0_12 = arith.constant 0 : index
    %24 = vector.load %arg4[%c0_11, %c0_12] : memref<128x128xf32, #tpu.memory_space<vmem>>, vector<128x128xf32>
    %c0_13 = arith.constant 0 : index
    %c0_14 = arith.constant 0 : index
    %25 = vector.load %arg5[%c0_13, %c0_14] : memref<1x128xf32, #tpu.memory_space<vmem>>, vector<1x128xf32>
    %26 = arith.mulf %23, %23 : vector<8x128xf32>
    %cst_15 = arith.constant dense<0.000000e+00> : vector<8xf32>
    %27 = vector.multi_reduction <add>, %26, %cst_15 [1] : vector<8x128xf32> to vector<8xf32>
    %28 = vector.shape_cast %27 : vector<8xf32> to vector<8x1xf32>
    %29 = math.sqrt %28 : vector<8x1xf32>
    %cst_16 = arith.constant 9.99999974E-5 : f32
    %30 = vector.broadcast %cst_16 : f32 to vector<8x1xf32>
    %31 = arith.addf %29, %30 : vector<8x1xf32>
    %cst_17 = arith.constant 1.000000e+00 : f32
    %32 = vector.broadcast %cst_17 : f32 to vector<8x1xf32>
    %33 = arith.divf %32, %31 : vector<8x1xf32>
    %34 = vector.broadcast %33 : vector<8x1xf32> to vector<8x128xf32>
    %35 = arith.mulf %23, %34 : vector<8x128xf32>
    %cst_18 = arith.constant dense<0.000000e+00> : vector<8x128xf32>
    %36 = tpu.matmul %35, %24, %cst_18 {dimension_numbers = #tpu.dot_dimension_numbers<[1], [0], [0], [1], [0, 0, 1, 1], [], []>, precision = #tpu.contract_precision<fp32>} : vector<8x128xf32>, vector<128x128xf32>, vector<8x128xf32> -> vector<8x128xf32>
    %37 = vector.broadcast %25 : vector<1x128xf32> to vector<8x128xf32>
    %38 = arith.addf %36, %37 : vector<8x128xf32>
    %cst_19 = arith.constant 5.000000e-01 : f32
    %39 = vector.broadcast %cst_19 : f32 to vector<8x128xf32>
    %40 = arith.mulf %39, %38 : vector<8x128xf32>
    %cst_20 = arith.constant 0.707106769 : f32
    %41 = vector.broadcast %cst_20 : f32 to vector<8x128xf32>
    %42 = arith.mulf %38, %41 : vector<8x128xf32>
    %43 = math.erf %42 : vector<8x128xf32>
    %cst_21 = arith.constant 1.000000e+00 : f32
    %44 = vector.broadcast %cst_21 : f32 to vector<8x128xf32>
    %45 = arith.addf %44, %43 : vector<8x128xf32>
    %46 = arith.mulf %40, %45 : vector<8x128xf32>
    %c0_22 = arith.constant 0 : index
    %c0_23 = arith.constant 0 : index
    %47 = vector.load %arg6[%c0_22, %c0_23] : memref<8x128xf32, #tpu.memory_space<vmem>>, vector<8x128xf32>
    tpu.vector_store %arg6[%c0_22, %c0_23], %46 {strides = array<i32>} : memref<8x128xf32, #tpu.memory_space<vmem>>, vector<8x128xf32>,
    return
  }
  func.func @transform_0(%arg0: i32) -> (i32, i32) {
    %c0_i32 = arith.constant 0 : i32
    %c0_i32_0 = arith.constant 0 : i32
    return %arg0, %c0_i32 : i32, i32
  }
  func.func @transform_1(%arg0: i32) -> (i32, i32) {
    %c0_i32 = arith.constant 0 : i32
    %c0_i32_0 = arith.constant 0 : i32
    %c0_i32_1 = arith.constant 0 : i32
    return %c0_i32, %c0_i32_0 : i32, i32
  }
  func.func @transform_2(%arg0: i32) -> (i32, i32) {
    %c0_i32 = arith.constant 0 : i32
    %c0_i32_0 = arith.constant 0 : i32
    %c0_i32_1 = arith.constant 0 : i32
    return %c0_i32, %c0_i32_0 : i32, i32
  }
  func.func @transform_3(%arg0: i32) -> (i32, i32) {
    %c0_i32 = arith.constant 0 : i32
    %c0_i32_0 = arith.constant 0 : i32
    %c0_i32_1 = arith.constant 0 : i32
    return %c0_i32, %c0_i32_0 : i32, i32
  }
  func.func @transform_4(%arg0: i32) -> (i32, i32) {
    %c0_i32 = arith.constant 0 : i32
    %c0_i32_0 = arith.constant 0 : i32
    %c0_i32_1 = arith.constant 0 : i32
    return %c0_i32, %c0_i32_0 : i32, i32
  }
  func.func @transform_5(%arg0: i32) -> (i32, i32) {
    %c0_i32 = arith.constant 0 : i32
    %c0_i32_0 = arith.constant 0 : i32
    return %arg0, %c0_i32 : i32, i32
  }
}

</mosaic_0001>

<bundles_post_ra>
// kernel: ff_network_forward.1
= control target key start
LH: loop header
LB: loop body
LE: loop exit
PB: predicated region body
PF: predicated region fallthrough
CT: control target
= control target key end

     0   :  { %10 = vsyncpa [#allocation3], 0  ;;  %s3072_s0 = inlined_call_operand.vmem [shape: f32[8,128], index: 0, kind: input, shape index: {}]   ;;  %s3073_s1 = inlined_call_operand.hbm [shape: f32[128,128], index: 1, kind: input, shape index: {}]   ;;  %s3074_s2 = inlined_call_operand.vmem [shape: f32[1,128], index: 2, kind: input, shape index: {}]   ;;  %s3075_s3 = inlined_call_operand.hbm [shape: f32[128,128], index: 3, kind: input, shape index: {}]   ;;  %s3076_s4 = inlined_call_operand.vmem [shape: f32[1,128], index: 4, kind: input, shape index: {}]   ;;  %s3077_s5 = inlined_call_operand.hbm [shape: f32[8,128], index: 5, kind: output, shape index: {}]  }
   0x1   :  { %11 = vsyncpa [#allocation6], 0 }
   0x2   :  { %12 = vsyncpa [#allocation4], 0  ;;  %s2461_s18 = smov [#allocation2]   ;;  %s2389_s22 = scalar_lea.hbm %s3073_s1, 2048 }
   0x3   :  { %s20_s19 = sshll.u32 %s2461_s18, 4  ;;  %p2390_p0 = scmp.ne.s32.totalorder %s3073_s1, %s2389_s22  ;;  %s21_s19 = int_to_ptr.vmem [resolvable:$true] %s20_s19 }
   0x4   :  { %p2393_p1 = scmp.lt.u32.totalorder %s2389_s22, %s3073_s1 }
   0x6   :  { %p2395_p2 = pnand %p2393_p1, %p2390_p0 }
   0x8   :  { %2398 = shalt.err (!%p2395_p2)
}
   0x9   :  { %s2399_s27 = scalar_lea.vmem %s21_s19, 2048  ;;  %p2404_p4 = scmp.lt.s32.totalorder %s21_s19, %s21_s19 }
   0xa   :  { %p2400_p3 = scmp.ne.s32.totalorder %s21_s19, %s2399_s27  ;;  %p2405_p5 = scmp.lt.s32.totalorder %s2399_s27, %s2399_s27 }
   0xc   :  { %p2406_p6 = por %p2405_p5, %p2404_p4 }
   0xe   :  { %p2407_p7 = pnand %p2406_p6, %p2400_p3 }
  0x10   :  { %2410 = shalt.err (!%p2407_p7)
}
  0x11   :  { %s2462_s28 = smov 128   ;;  %s2463_s29 = smov 8  }
  0x12   :  { %26 = dma.hbm_to_vmem [thread:$0]  %s3073_s1, 2048, %s21_s19, [#allocation3], %s2462_s28, %s2462_s28, %s2463_s29  }
  0x13   :  { %s2464_s7 = smov [#allocation5]   ;;  %s2411_s11 = scalar_lea.hbm %s3075_s3, 2048 }
  0x14   :  { %s34_s8 = sshll.u32 %s2464_s7, 4  ;;  %p2412_p8 = scmp.ne.s32.totalorder %s3075_s3, %s2411_s11  ;;  %s35_s8 = int_to_ptr.vmem [resolvable:$true] %s34_s8 }
  0x15   :  { %p2415_p9 = scmp.lt.u32.totalorder %s2411_s11, %s3075_s3 }
  0x17   :  { %p2417_p10 = pnand %p2415_p9, %p2412_p8 }
  0x19   :  { %2420 = shalt.err (!%p2417_p10)
}
  0x1a   :  { %s2421_s16 = scalar_lea.vmem %s35_s8, 2048  ;;  %p2426_p12 = scmp.lt.s32.totalorder %s35_s8, %s35_s8 }
  0x1b   :  { %p2422_p11 = scmp.ne.s32.totalorder %s35_s8, %s2421_s16  ;;  %p2427_p13 = scmp.lt.s32.totalorder %s2421_s16, %s2421_s16 }
  0x1d   :  { %p2428_p0 = por %p2427_p13, %p2426_p12 }
  0x1f   :  { %p2429_p1 = pnand %p2428_p0, %p2422_p11 }
  0x21   :  { %2432 = shalt.err (!%p2429_p1)
}
  0x22   :  { %40 = dma.hbm_to_vmem [thread:$0]  %s3075_s3, 2048, %s35_s8, [#allocation6], %s2462_s28, %s2462_s28, %s2463_s29  }
  0x23   :  { %2455 = dma.done.wait [#allocation3], 2048  }
  0x24   :  { %2456 = vsyncadd [#allocation3], 4294965248 }
  0x25   :  { %2457 = dma.done.wait [#allocation6], 2048  }
  0x26   :  { %2458 = vsyncadd [#allocation6], 4294965248  ;;  %v2526_v0 = vld [vmem:[%s3072_s0] sm:$0xff]  ;;  %v51_v3 = vld [vmem:[#allocation2 + $0x8] sm:$0xff]  ;;  %v2465_v7 = vmov 0.0|0.0   ;;  %vm2466_vm0 = vmmov 0  }
  0x27   :  { %v67_v1 = vmul.f32 %v2526_v0, %v2526_v0  ;;  %v50_v2 = vld [vmem:[#allocation2] sm:$0xff]  ;;  %v91_v5 = vand.u32 4294901760, %v51_v3  ;;  %2059 = vmatprep.subr.bf16.mxu0 %v2465_v7  ;;  %v52_v8 = vld [vmem:[#allocation2 + $0x10] sm:$0xff]  ;;  %v53_v9 = vld [vmem:[#allocation2 + $0x18] sm:$0xff]  ;;  %2203 = vmatprep.subr.bf16.mxu1 %v2465_v7  ;;  %v2467_v57 = vmov 0.0   ;;  %s2468_s21 = smov [#allocation7]  }
  0x28   :  { %v88_v4 = vand.u32 4294901760, %v50_v2  ;;  %v94_v10 = vand.u32 4294901760, %v52_v8  ;;  %v97_v11 = vand.u32 4294901760, %v53_v9  ;;  %v54_v13 = vld [vmem:[#allocation2 + $0x20] sm:$0xff]  ;;  %v55_v14 = vld [vmem:[#allocation2 + $0x28] sm:$0xff]  ;;  %v56_v18 = vld [vmem:[#allocation2 + $0x30] sm:$0xff]  ;;  %1671 = vmatprep.mubr.msk.f32.mxu0 %vm2466_vm0, %v2467_v57  ;;  %1881 = vmatprep.mubr.msk.f32.mxu1 %vm2466_vm0, %v2467_v57 }
  0x29   :  { %68 = vadd.xlane.f32.xlu0 %v67_v1  ;;  %v100_v15 = vand.u32 4294901760, %v54_v13  ;;  %v103_v16 = vand.u32 4294901760, %v55_v14  ;;  %v57_v19 = vld [vmem:[#allocation2 + $0x38] sm:$0xff]  ;;  %v106_v20 = vand.u32 4294901760, %v56_v18  ;;  %v2545_v23 = vsub.f32 %v51_v3, %v91_v5  ;;  %v58_v26 = vld [vmem:[#allocation2 + $0x40] sm:$0xff]  ;;  %v59_v27 = vld [vmem:[#allocation2 + $0x48] sm:$0xff] }
  0x2a   :  { %v2530_v6 = vpack.c.bf16 %v91_v5, %v88_v4  ;;  %v2536_v12 = vpack.c.bf16 %v97_v11, %v94_v10  ;;  %v109_v21 = vand.u32 4294901760, %v57_v19  ;;  %v2543_v22 = vsub.f32 %v50_v2, %v88_v4  ;;  %v60_v28 = vld [vmem:[#allocation2 + $0x50] sm:$0xff]  ;;  %v61_v33 = vld [vmem:[#allocation2 + $0x58] sm:$0xff]  ;;  %v62_v34 = vld [vmem:[#allocation2 + $0x60] sm:$0xff]  ;;  %s1423_s22 = sshll.u32 %s2468_s21, 4  ;;  %s1424_s22 = int_to_ptr.vmem [resolvable:$true] %s1423_s22 }
  0x2b   :  { %v2540_v17 = vpack.c.bf16 %v103_v16, %v100_v15  ;;  %v2547_v24 = vsub.f32 %v52_v8, %v94_v10  ;;  %v2549_v25 = vsub.f32 %v53_v9, %v97_v11  ;;  %v2552_v29 = vsub.f32 %v54_v13, %v100_v15  ;;  %v63_v35 = vld [vmem:[#allocation2 + $0x68] sm:$0xff]  ;;  %v64_v40 = vld [vmem:[#allocation2 + $0x70] sm:$0xff]  ;;  %v65_v44 = vld [vmem:[#allocation2 + $0x78] sm:$0xff]  ;;  %s2433_s23 = scalar_lea.vmem %s1424_s22, 128  ;;  %p2438_p3 = scmp.lt.s32.totalorder %s1424_s22, %s1424_s22 }
  0x2c   :  { %2061 = vmatpush3.bf16.msra.mxu0 %v2530_v6  ;;  %v2554_v30 = vsub.f32 %v55_v14, %v103_v16  ;;  %v2556_v31 = vpack.c.bf16 %v109_v21, %v106_v20  ;;  %v2558_v32 = vsub.f32 %v56_v18, %v106_v20  ;;  %v2560_v36 = vsub.f32 %v57_v19, %v109_v21  ;;  %p2434_p2 = scmp.ne.s32.totalorder %s1424_s22, %s2433_s23  ;;  %p2439_p4 = scmp.lt.s32.totalorder %s2433_s23, %s2433_s23 }
  0x2d   :  { %2062 = vmatprep.subr.bf16.mxu0 %v2465_v7  ;;  %v112_v37 = vand.u32 4294901760, %v58_v26  ;;  %v115_v38 = vand.u32 4294901760, %v59_v27  ;;  %v118_v39 = vand.u32 4294901760, %v60_v28  ;;  %v121_v41 = vand.u32 4294901760, %v61_v33 }
  0x2e   :  { %v124_v42 = vand.u32 4294901760, %v62_v34  ;;  %v127_v43 = vand.u32 4294901760, %v63_v35  ;;  %v130_v45 = vand.u32 4294901760, %v64_v40  ;;  %v133_v53 = vand.u32 4294901760, %v65_v44  ;;  %p2440_p5 = por %p2439_p4, %p2438_p3 }
  0x2f   :  { %v2564_v46 = vpack.c.bf16 %v115_v38, %v112_v37  ;;  %v2566_v47 = vsub.f32 %v58_v26, %v112_v37  ;;  %v2568_v48 = vsub.f32 %v59_v27, %v115_v38  ;;  %v2570_v49 = vsub.f32 %v60_v28, %v118_v39 }
  0x30   :  { %2064 = vmatpush3.bf16.msra.mxu0 %v2536_v12  ;;  %v2572_v50 = vsub.f32 %v61_v33, %v121_v41  ;;  %v2574_v51 = vsub.f32 %v62_v34, %v124_v42  ;;  %v2576_v52 = vsub.f32 %v63_v35, %v127_v43  ;;  %v2578_v54 = vsub.f32 %v64_v40, %v130_v45  ;;  %p2441_p6 = pnand %p2440_p5, %p2434_p2 }
  0x31   :  { %2065 = vmatprep.subr.bf16.mxu0 %v2465_v7  ;;  %v2581_v55 = vpack.c.bf16 %v121_v41, %v118_v39  ;;  %v2584_v56 = vsub.f32 %v65_v44, %v133_v53  ;;  %v2591_v58 = vpack.c.bf16 %v127_v43, %v124_v42  ;;  %v2595_v59 = vpack.c.bf16 %v133_v53, %v130_v45 }
  0x32   :  { %v181_v60 = vand.u32 4294901760, %v2543_v22  ;;  %v188_v61 = vand.u32 4294901760, %v2545_v23  ;;  %v195_v3 = vand.u32 4294901760, %v2547_v24  ;;  %v202_v4 = vand.u32 4294901760, %v2549_v25 }
  0x33   :  { %v209_v13 = vand.u32 4294901760, %v2552_v29  ;;  %v216_v14 = vand.u32 4294901760, %v2554_v30  ;;  %v223_v21 = vand.u32 4294901760, %v2558_v32  ;;  %v3086_v26 = vand.u32 4294901760, %v2560_v36 }
  0x34   :  { %2067 = vmatpush3.bf16.msra.mxu0 %v2540_v17  ;;  %v182_v62 = vsub.f32 %v2543_v22, %v181_v60  ;;  %v189_v63 = vsub.f32 %v2545_v23, %v188_v61  ;;  %v196_v8 = vsub.f32 %v2547_v24, %v195_v3  ;;  %v203_v9 = vsub.f32 %v2549_v25, %v202_v4 }
  0x35   :  { %2068 = vmatprep.subr.bf16.mxu0 %v2465_v7  ;;  %v210_v16 = vsub.f32 %v2552_v29, %v209_v13  ;;  %v217_v18 = vsub.f32 %v2554_v30, %v216_v14  ;;  %v224_v28 = vsub.f32 %v2558_v32, %v223_v21  ;;  %v231_v33 = vsub.f32 %v2560_v36, %v3086_v26 }
  0x36   :  { %v183_v1 = vand.u32 4294901760, %v182_v62  ;;  %v190_v2 = vand.u32 4294901760, %v189_v63  ;;  %v197_v10 = vand.u32 4294901760, %v196_v8  ;;  %v204_v11 = vand.u32 4294901760, %v203_v9 }
  0x37   :  { %v211_v19 = vand.u32 4294901760, %v210_v16  ;;  %v218_v20 = vand.u32 4294901760, %v217_v18  ;;  %v225_v34 = vand.u32 4294901760, %v224_v28  ;;  %v232_v35 = vand.u32 4294901760, %v231_v33 }
  0x38   :  { %2070 = vmatpush3.bf16.msra.mxu0 %v2556_v31  ;;  %v2610_v5 = vpack.c.bf16 %v190_v2, %v183_v1  ;;  %v2620_v15 = vpack.c.bf16 %v204_v11, %v197_v10  ;;  %v3085_v37 = vand.u32 4294901760, %v2566_v47  ;;  %v3084_v38 = vand.u32 4294901760, %v2568_v48 }
  0x39   :  { %2071 = vmatprep.subr.bf16.mxu0 %v2465_v7  ;;  %v2630_v27 = vpack.c.bf16 %v218_v20, %v211_v19  ;;  %v2093_v39 = vpack.c.bf16 %v232_v35, %v225_v34  ;;  %v3083_v44 = vand.u32 4294901760, %v2570_v49  ;;  %v3082_v45 = vand.u32 4294901760, %v2572_v50 }
  0x3a   :  { %v238_v40 = vsub.f32 %v2566_v47, %v3085_v37  ;;  %v245_v41 = vsub.f32 %v2568_v48, %v3084_v38  ;;  %v3081_v8 = vand.u32 4294901760, %v2574_v51  ;;  %v3080_v9 = vand.u32 4294901760, %v2576_v52 }
  0x3b   :  { %v252_v62 = vsub.f32 %v2570_v49, %v3083_v44  ;;  %v259_v63 = vsub.f32 %v2572_v50, %v3082_v45  ;;  %v3079_v20 = vand.u32 4294901760, %v2578_v54  ;;  %v3078_v28 = vand.u32 4294901760, %v2584_v56 }
  0x3c   :  { %2073 = vmatpush3.bf16.msra.mxu0 %v2564_v46  ;;  %v239_v42 = vand.u32 4294901760, %v238_v40  ;;  %v246_v43 = vand.u32 4294901760, %v245_v41  ;;  %v266_v11 = vsub.f32 %v2574_v51, %v3081_v8  ;;  %v273_v16 = vsub.f32 %v2576_v52, %v3080_v9 }
  0x3d   :  { %2074 = vmatprep.subr.bf16.mxu0 %v2465_v7  ;;  %v253_v1 = vand.u32 4294901760, %v252_v62  ;;  %v260_v2 = vand.u32 4294901760, %v259_v63  ;;  %v280_v34 = vsub.f32 %v2578_v54, %v3079_v20  ;;  %v287_v35 = vsub.f32 %v2584_v56, %v3078_v28 }
  0x3e   :  { %v2096_v53 = vpack.c.bf16 %v246_v43, %v239_v42  ;;  %v267_v18 = vand.u32 4294901760, %v266_v11  ;;  %v274_v19 = vand.u32 4294901760, %v273_v16  ;;  %v2108_v43 = vpack.c.bf16 %v2545_v23, %v2543_v22 }
  0x3f   :  { %v2099_v10 = vpack.c.bf16 %v260_v2, %v253_v1  ;;  %v281_v40 = vand.u32 4294901760, %v280_v34  ;;  %v288_v41 = vand.u32 4294901760, %v287_v35  ;;  %v2111_v62 = vpack.c.bf16 %v2549_v25, %v2547_v24 }
  0x40   :  { %2076 = vmatpush3.bf16.msra.mxu0 %v2581_v55  ;;  %v2102_v33 = vpack.c.bf16 %v274_v19, %v267_v18  ;;  %v2114_v63 = vpack.c.bf16 %v2554_v30, %v2552_v29  ;;  %v2117_v1 = vpack.c.bf16 %v2560_v36, %v2558_v32  ;;  %v2120_v2 = vpack.c.bf16 %v2568_v48, %v2566_v47 }
  0x41   :  { %2077 = vmatprep.subr.bf16.mxu0 %v2465_v7  ;;  %v2105_v42 = vpack.c.bf16 %v288_v41, %v281_v40  ;;  %v2123_v11 = vpack.c.bf16 %v2572_v50, %v2570_v49  ;;  %v2126_v16 = vpack.c.bf16 %v2576_v52, %v2574_v51  ;;  %v2129_v18 = vpack.c.bf16 %v2584_v56, %v2578_v54 }
  0x42   :  { %v2162_v22 = vpack.c.bf16 %v216_v14, %v209_v13  ;;  %v3096_v23 = vand.u32 4294901760, %v2560_v36  ;;  %v3097_v25 = vand.u32 4294901760, %v2566_v47  ;;  %v3099_v29 = vand.u32 4294901760, %v2570_v49 }
  0x43   :  { %v3100_v30 = vand.u32 4294901760, %v2572_v50  ;;  %v3101_v32 = vand.u32 4294901760, %v2574_v51  ;;  %v3102_v36 = vand.u32 4294901760, %v2576_v52  ;;  %v3103_v47 = vand.u32 4294901760, %v2578_v54 }
  0x44   :  { %2079 = vmatpush3.bf16.msra.mxu0 %v2591_v58  ;;  %v2165_v24 = vpack.c.bf16 %v3096_v23, %v223_v21  ;;  %v736_v21 = vld [vmem:[#allocation5 + $0x18] sm:$0xff] }
  0x45   :  { %2080 = vmatprep.subr.bf16.mxu0 %v2465_v7 }
  0x48   :  { %2082 = vmatpush3.bf16.msra.mxu0 %v2595_v59 }
  0x49   :  { %2083 = vmatprep.subr.bf16.mxu0 %v2465_v7 }
  0xb6   :  { %v69_v19 = vpop.xlane.xlu0 %68 }
  0xb7   :  { %2377 = vrsqrt.f32 %v69_v19  ;;  %vm72_vm1 = vcmp.eq.f32.partialorder %v69_v19, inf  ;;  %v75_v40 = vand.u32 2147483648, %v69_v19  ;;  %vm74_vm2 = vcmp.eq.f32.partialorder %v69_v19, 0.0 }
  0xc1   :  { %v2378_v34 = vpop.eup %2377 }
  0xc2   :  { %v71_v35 = vmul.f32 %v2378_v34, %v69_v19  ;;  %v745_v34 = vld [vmem:[#allocation5 + $0x60] sm:$0xff] }
  0xc4   :  { %v73_v41 = vsel %vm72_vm1, %v69_v19, %v71_v35  ;;  %v744_v19 = vld [vmem:[#allocation5 + $0x58] sm:$0xff]  ;;  %v746_v35 = vld [vmem:[#allocation5 + $0x68] sm:$0xff] }
  0xc5   :  { %v76_v28 = vsel %vm74_vm2, %v75_v40, %v73_v41  ;;  %v804_v23 = vand.u32 4294901760, %v744_v19 }
  0xc6   :  { %v77_v20 = vadd.f32 0.0001, %v76_v28 }
  0xc8   :  { %2379 = vrcp.f32 %v77_v20 }
  0xd2   :  { %v2380_v9 = vpop.eup %2379 }
  0xd3   :  { %v80_v8 = vmul.f32 %v2380_v9, %v2526_v0  ;;  %v2156_v0 = vpack.c.bf16 %v188_v61, %v181_v60  ;;  %v3098_v60 = vand.u32 4294901760, %v2568_v48  ;;  %v3104_v48 = vand.u32 4294901760, %v2584_v56  ;;  %v734_v56 = vld [vmem:[#allocation5 + $0x8] sm:$0xff]  ;;  %v740_v9 = vld [vmem:[#allocation5 + $0x38] sm:$0xff] }
  0xd4   :  { %v792_v20 = vand.u32 4294901760, %v740_v9 }
  0xd5   :  { %v2687_v45 = vand.u32 4294901760, %v80_v8  ;;  %v2168_v61 = vpack.c.bf16 %v3098_v60, %v3097_v25  ;;  %v2177_v13 = vpack.c.bf16 %v3104_v48, %v3103_v47  ;;  %v810_v25 = vand.u32 4294901760, %v746_v35  ;;  %v748_v60 = vld [vmem:[#allocation5 + $0x78] sm:$0xff] }
  0xd6   :  { %v2828_v40 = vsub.f32 %v740_v9, %v792_v20  ;;  %v816_v48 = vand.u32 4294901760, %v748_v60 }
  0xd7   :  { %v169_v44 = vsub.f32 %v80_v8, %v2687_v45  ;;  %v739_v8 = vld [vmem:[#allocation5 + $0x30] sm:$0xff]  ;;  %v2844_v47 = vsub.f32 %v746_v35, %v810_v25 }
  0xd9   :  { %v170_v38 = vand.u32 4294901760, %v169_v44 }
  0xdb   :  { %v171_v37 = vsub.f32 %v169_v44, %v170_v38 }
  0xdd   :  { %v172_v26 = vand.u32 4294901760, %v171_v37 }
  0xdf   :  { %1672 = vmatmul.mubr.f32.vlgmr.msra.gmra.mrb[0].mxu0 %v172_v26 }
  0xe0   :  { %2085 = vmatpush3.bf16.msra.mxu0 %v2610_v5  ;;  %1706 = vmatprep.mubr.msk.f32.mxu0 %vm2466_vm0, %v2467_v57  ;;  %v2159_v5 = vpack.c.bf16 %v202_v4, %v195_v3  ;;  %v2171_v3 = vpack.c.bf16 %v3100_v30, %v3099_v29  ;;  %v2174_v4 = vpack.c.bf16 %v3102_v36, %v3101_v32 }
  0xe1   :  { %2086 = vmatprep.subr.bf16.mxu0 %v2465_v7  ;;  %v2840_v36 = vsub.f32 %v744_v19, %v804_v23 }
  0xe4   :  { %2088 = vmatpush3.bf16.msra.mxu0 %v2620_v15  ;;  %v735_v15 = vld [vmem:[#allocation5 + $0x10] sm:$0xff] }
  0xe5   :  { %2089 = vmatprep.subr.bf16.mxu0 %v2465_v7  ;;  %v777_v26 = vand.u32 4294901760, %v735_v15 }
  0xe8   :  { %2091 = vmatpush3.bf16.msra.mxu0 %v2630_v27  ;;  %v780_v27 = vand.u32 4294901760, %v736_v21 }
  0xe9   :  { %2092 = vmatprep.subr.bf16.mxu0 %v2465_v7 }
  0xea   :  { %v2804_v37 = vpack.c.bf16 %v780_v27, %v777_v26 }
  0xec   :  { %2094 = vmatpush3.bf16.msra.mxu0 %v2093_v39  ;;  %v738_v39 = vld [vmem:[#allocation5 + $0x28] sm:$0xff] }
  0xed   :  { %2095 = vmatprep.subr.bf16.mxu0 %v2465_v7 }
  0xf0   :  { %2097 = vmatpush3.bf16.msra.mxu0 %v2096_v53 }
  0xf1   :  { %2098 = vmatprep.subr.bf16.mxu0 %v2465_v7 }
  0xf4   :  { %2100 = vmatpush3.bf16.msra.mxu0 %v2099_v10  ;;  %v789_v10 = vand.u32 4294901760, %v739_v8 }
  0xf5   :  { %2101 = vmatprep.subr.bf16.mxu0 %v2465_v7 }
  0xf8   :  { %2103 = vmatpush3.bf16.msra.mxu0 %v2102_v33 }
  0xf9   :  { %2104 = vmatprep.subr.bf16.mxu0 %v2465_v7 }
  0xfc   :  { %2106 = vmatpush3.bf16.msra.mxu0 %v2105_v42  ;;  %v2815_v42 = vsub.f32 %v735_v15, %v777_v26 }
  0xfd   :  { %2107 = vmatprep.subr.bf16.mxu0 %v2465_v7 }
  0xff   :  { %1707 = vmatmul.mubr.f32.vlgmr.msra.gmra.mrb[0].mxu0 %v2687_v45 }
 0x100   :  { %2109 = vmatpush3.bf16.msra.mxu0 %v2108_v43  ;;  %1741 = vmatprep.mubr.msk.f32.mxu0 %vm2466_vm0, %v2467_v57  ;;  %v2817_v43 = vsub.f32 %v736_v21, %v780_v27 }
 0x101   :  { %2110 = vmatprep.subr.bf16.mxu0 %v2465_v7 }
 0x104   :  { %2112 = vmatpush3.bf16.msra.mxu0 %v2111_v62  ;;  %v741_v62 = vld [vmem:[#allocation5 + $0x40] sm:$0xff] }
 0x105   :  { %2113 = vmatprep.subr.bf16.mxu0 %v2465_v7  ;;  %v795_v41 = vand.u32 4294901760, %v741_v62 }
 0x107   :  { %v2834_v30 = vsub.f32 %v741_v62, %v795_v41  ;;  %v3095_v62 = vand.u32 4294901760, %v2828_v40 }
 0x108   :  { %2115 = vmatpush3.bf16.msra.mxu0 %v2114_v63  ;;  %v742_v63 = vld [vmem:[#allocation5 + $0x48] sm:$0xff] }
 0x109   :  { %2116 = vmatprep.subr.bf16.mxu0 %v2465_v7  ;;  %v914_v19 = vsub.f32 %v2828_v40, %v3095_v62 }
 0x10b   :  { %v915_v35 = vand.u32 4294901760, %v914_v19 }
 0x10c   :  { %2118 = vmatpush3.bf16.msra.mxu0 %v2117_v1  ;;  %v743_v1 = vld [vmem:[#allocation5 + $0x50] sm:$0xff] }
 0x10d   :  { %2119 = vmatprep.subr.bf16.mxu0 %v2465_v7 }
 0x110   :  { %2121 = vmatpush3.bf16.msra.mxu0 %v2120_v2 }
 0x111   :  { %2122 = vmatprep.subr.bf16.mxu0 %v2465_v7 }
 0x114   :  { %2124 = vmatpush3.bf16.msra.mxu0 %v2123_v11 }
 0x115   :  { %2125 = vmatprep.subr.bf16.mxu0 %v2465_v7 }
 0x118   :  { %2127 = vmatpush3.bf16.msra.mxu0 %v2126_v16  ;;  %v2824_v16 = vpack.c.bf16 %v792_v20, %v789_v10 }
 0x119   :  { %2128 = vmatprep.subr.bf16.mxu0 %v2465_v7 }
 0x11c   :  { %2130 = vmatpush3.bf16.msra.mxu0 %v2129_v18  ;;  %v2826_v18 = vsub.f32 %v739_v8, %v789_v10 }
 0x11d   :  { %2131 = vmatprep.subr.bf16.mxu0 %v2465_v7 }
 0x11e   :  { %v906_v20 = vand.u32 4294901760, %v2826_v18 }
 0x11f   :  { %1742 = vmatmul.mubr.f32.vlgmr.msra.gmra.mrb[0].mxu0 %v169_v44 }
 0x120   :  { %2133 = vmatpush3.bf16.msra.mxu0 %v2530_v6  ;;  %1776 = vmatprep.mubr.msk.f32.mxu0 %vm2466_vm0, %v2467_v57 }
 0x121   :  { %2134 = vmatprep.subr.bf16.mxu0 %v2465_v7 }
 0x124   :  { %2136 = vmatpush3.bf16.msra.mxu0 %v2536_v12 }
 0x125   :  { %2137 = vmatprep.subr.bf16.mxu0 %v2465_v7 }
 0x128   :  { %2139 = vmatpush3.bf16.msra.mxu0 %v2540_v17 }
 0x129   :  { %2140 = vmatprep.subr.bf16.mxu0 %v2465_v7 }
 0x12c   :  { %2142 = vmatpush3.bf16.msra.mxu0 %v2556_v31 }
 0x12d   :  { %2143 = vmatprep.subr.bf16.mxu0 %v2465_v7 }
 0x130   :  { %2145 = vmatpush3.bf16.msra.mxu0 %v2564_v46 }
 0x131   :  { %2146 = vmatprep.subr.bf16.mxu0 %v2465_v7 }
 0x134   :  { %2148 = vmatpush3.bf16.msra.mxu0 %v2581_v55 }
 0x135   :  { %2149 = vmatprep.subr.bf16.mxu0 %v2465_v7 }
 0x138   :  { %2151 = vmatpush3.bf16.msra.mxu0 %v2591_v58 }
 0x139   :  { %2152 = vmatprep.subr.bf16.mxu0 %v2465_v7 }
 0x13c   :  { %2154 = vmatpush3.bf16.msra.mxu0 %v2595_v59 }
 0x13d   :  { %2155 = vmatprep.subr.bf16.mxu0 %v2465_v7 }
 0x13f   :  { %1777 = vmatmul.mubr.f32.vlgmr.msra.gmra.mrb[0].mxu0 %v170_v38  ;;  %v737_v38 = vld [vmem:[#allocation5 + $0x20] sm:$0xff] }
 0x140   :  { %2157 = vmatpush3.bf16.msra.mxu0 %v2156_v0  ;;  %1811 = vmatprep.mubr.msk.f32.mxu0 %vm2466_vm0, %v2467_v57  ;;  %v783_v44 = vand.u32 4294901760, %v737_v38  ;;  %v798_v0 = vand.u32 4294901760, %v742_v63 }
 0x141   :  { %2158 = vmatprep.subr.bf16.mxu0 %v2465_v7 }
 0x142   :  { %v2820_v2 = vsub.f32 %v737_v38, %v783_v44  ;;  %v2832_v29 = vpack.c.bf16 %v798_v0, %v795_v41  ;;  %v3094_v41 = vand.u32 4294901760, %v2834_v30 }
 0x144   :  { %2160 = vmatpush3.bf16.msra.mxu0 %v2159_v5  ;;  %v801_v5 = vand.u32 4294901760, %v743_v1  ;;  %v892_v38 = vand.u32 4294901760, %v2820_v2 }
 0x145   :  { %2161 = vmatprep.subr.bf16.mxu0 %v2465_v7 }
 0x146   :  { %v2838_v32 = vsub.f32 %v743_v1, %v801_v5  ;;  %v907_v1 = vsub.f32 %v2826_v18, %v906_v20 }
 0x148   :  { %2163 = vmatpush3.bf16.msra.mxu0 %v2162_v22  ;;  %v747_v22 = vld [vmem:[#allocation5 + $0x70] sm:$0xff] }
 0x149   :  { %2164 = vmatprep.subr.bf16.mxu0 %v2465_v7 }
 0x14c   :  { %2166 = vmatpush3.bf16.msra.mxu0 %v2165_v24  ;;  %v807_v24 = vand.u32 4294901760, %v745_v34 }
 0x14d   :  { %2167 = vmatprep.subr.bf16.mxu0 %v2465_v7 }
 0x150   :  { %2169 = vmatpush3.bf16.msra.mxu0 %v2168_v61  ;;  %v813_v61 = vand.u32 4294901760, %v747_v22 }
 0x151   :  { %2170 = vmatprep.subr.bf16.mxu0 %v2465_v7 }
 0x154   :  { %2172 = vmatpush3.bf16.msra.mxu0 %v2171_v3  ;;  %v2836_v3 = vsub.f32 %v742_v63, %v798_v0 }
 0x155   :  { %2173 = vmatprep.subr.bf16.mxu0 %v2465_v7 }
 0x156   :  { %v3093_v0 = vand.u32 4294901760, %v2836_v3 }
 0x158   :  { %2175 = vmatpush3.bf16.msra.mxu0 %v2174_v4  ;;  %v2842_v4 = vsub.f32 %v745_v34, %v807_v24  ;;  %v908_v34 = vand.u32 4294901760, %v907_v1 }
 0x159   :  { %2176 = vmatprep.subr.bf16.mxu0 %v2465_v7 }
 0x15c   :  { %2178 = vmatpush3.bf16.msra.mxu0 %v2177_v13  ;;  %v2846_v13 = vsub.f32 %v747_v22, %v813_v61  ;;  %v921_v22 = vsub.f32 %v2834_v30, %v3094_v41 }
 0x15d   :  { %2179 = vmatprep.subr.bf16.mxu0 %v2465_v7 }
 0x15f   :  { %1812 = vmatmul.mubr.f32.vlgmr.msra.gmra.mrb[0].mxu0 %v2687_v45 }
 0x160   :  { %2181 = vmatpush3.bf16.msra.mxu0 %v2530_v6  ;;  %1846 = vmatprep.mubr.msk.f32.mxu0 %vm2466_vm0, %v2467_v57  ;;  %v1433_v6 = vld [vmem:[%s3074_s2] ss:$0 sm:$0xff] }
 0x161   :  { %2182 = vmatprep.subr.bf16.mxu0 %v2465_v7 }
 0x164   :  { %2184 = vmatpush3.bf16.msra.mxu0 %v2536_v12 }
 0x165   :  { %2185 = vmatprep.subr.bf16.mxu0 %v2465_v7 }
 0x168   :  { %2187 = vmatpush3.bf16.msra.mxu0 %v2540_v17 }
 0x169   :  { %2188 = vmatprep.subr.bf16.mxu0 %v2465_v7 }
 0x16c   :  { %2190 = vmatpush3.bf16.msra.mxu0 %v2556_v31 }
 0x16d   :  { %2191 = vmatprep.subr.bf16.mxu0 %v2465_v7 }
 0x170   :  { %2193 = vmatpush3.bf16.msra.mxu0 %v2564_v46 }
 0x171   :  { %2194 = vmatprep.subr.bf16.mxu0 %v2465_v7 }
 0x174   :  { %2196 = vmatpush3.bf16.msra.mxu0 %v2581_v55  ;;  %v733_v55 = vld [vmem:[#allocation5] sm:$0xff] }
 0x175   :  { %2197 = vmatprep.subr.bf16.mxu0 %v2465_v7 }
 0x178   :  { %2199 = vmatpush3.bf16.msra.mxu0 %v2591_v58  ;;  %v771_v58 = vand.u32 4294901760, %v733_v55 }
 0x179   :  { %2200 = vmatprep.subr.bf16.mxu0 %v2465_v7 }
 0x17a   :  { %v2811_v28 = vsub.f32 %v733_v55, %v771_v58 }
 0x17c   :  { %2202 = vmatpush3.bf16.msra.mxu0 %v2595_v59  ;;  %v774_v59 = vand.u32 4294901760, %v734_v56 }
 0x17e   :  { %v2800_v14 = vpack.c.bf16 %v774_v59, %v771_v58  ;;  %v2813_v33 = vsub.f32 %v734_v56, %v774_v59  ;;  %v878_v56 = vand.u32 4294901760, %v2815_v42  ;;  %v885_v58 = vand.u32 4294901760, %v2817_v43 }
 0x17f   :  { %1847 = vmatmul.mubr.f32.vlgmr.msra.gmra.mrb[0].mxu0 %v2687_v45  ;;  %v786_v45 = vand.u32 4294901760, %v738_v39 }
 0x180   :  { %2205 = vmatpush3.bf16.msra.mxu1 %v2800_v14  ;;  %v879_v15 = vsub.f32 %v2815_v42, %v878_v56  ;;  %v886_v21 = vsub.f32 %v2817_v43, %v885_v58 }
 0x181   :  { %2206 = vmatprep.subr.bf16.mxu1 %v2465_v7  ;;  %v2808_v53 = vpack.c.bf16 %v786_v45, %v783_v44  ;;  %v2822_v11 = vsub.f32 %v738_v39, %v786_v45  ;;  %v893_v45 = vsub.f32 %v2820_v2, %v892_v38 }
 0x182   :  { %v880_v26 = vand.u32 4294901760, %v879_v15  ;;  %v887_v27 = vand.u32 4294901760, %v886_v21  ;;  %v3090_v15 = vand.u32 4294901760, %v2842_v4  ;;  %v3089_v21 = vand.u32 4294901760, %v2844_v47 }
 0x183   :  { %v899_v39 = vand.u32 4294901760, %v2822_v11  ;;  %v894_v9 = vand.u32 4294901760, %v893_v45 }
 0x184   :  { %2208 = vmatpush3.bf16.msra.mxu1 %v2804_v37  ;;  %v2884_v44 = vpack.c.bf16 %v887_v27, %v880_v26  ;;  %v949_v27 = vsub.f32 %v2842_v4, %v3090_v15  ;;  %v956_v45 = vsub.f32 %v2844_v47, %v3089_v21 }
 0x185   :  { %2209 = vmatprep.subr.bf16.mxu1 %v2465_v7  ;;  %v900_v8 = vsub.f32 %v2822_v11, %v899_v39 }
 0x187   :  { %v901_v10 = vand.u32 4294901760, %v900_v8  ;;  %v950_v8 = vand.u32 4294901760, %v949_v27  ;;  %v2267_v27 = vpack.c.bf16 %v2840_v36, %v2838_v32 }
 0x188   :  { %2211 = vmatpush3.bf16.msra.mxu1 %v2808_v53 }
 0x189   :  { %2212 = vmatprep.subr.bf16.mxu1 %v2465_v7  ;;  %v2894_v63 = vpack.c.bf16 %v901_v10, %v894_v9  ;;  %v957_v9 = vand.u32 4294901760, %v956_v45  ;;  %v3088_v10 = vand.u32 4294901760, %v2846_v13  ;;  %v2270_v45 = vpack.c.bf16 %v2844_v47, %v2842_v4 }
 0x18b   :  { %v2246_v19 = vpack.c.bf16 %v957_v9, %v950_v8 }
 0x18c   :  { %2214 = vmatpush3.bf16.msra.mxu1 %v2824_v16 }
 0x18d   :  { %2215 = vmatprep.subr.bf16.mxu1 %v2465_v7 }
 0x190   :  { %2217 = vmatpush3.bf16.msra.mxu1 %v2832_v29 }
 0x191   :  { %2218 = vmatprep.subr.bf16.mxu1 %v2465_v7 }
 0x252   :  { %v724_v12 = vpop.f32.mrb[0].mxu0 }
 0x253   :  { %v2347_v17 = vadd.f32 %v1433_v6, %v724_v12  ;;  %v1848_v31 = vpop.f32.mrb[1].mxu0  ;;  %v2849_v6 = vpack.c.bf16 %v804_v23, %v801_v5  ;;  %v2852_v12 = vsub.f32 %v748_v60, %v816_v48  ;;  %v2237_v5 = vpack.c.bf16 %v915_v35, %v908_v34 }
 0x254   :  { %v2859_v31 = vpack.c.bf16 %v816_v48, %v813_v61  ;;  %v928_v23 = vsub.f32 %v2836_v3, %v3093_v0  ;;  %v3092_v60 = vand.u32 4294901760, %v2838_v32  ;;  %v3091_v61 = vand.u32 4294901760, %v2840_v36 }
 0x255   :  { %v729_v46 = vmul.f32 0.70710677, %v2347_v17  ;;  %v728_v50 = vmul.f32 0.5, %v2347_v17  ;;  %2220 = vmatpush3.bf16.msra.mxu1 %v2849_v6  ;;  %v2855_v17 = vpack.c.bf16 %v810_v25, %v807_v24  ;;  %v922_v24 = vand.u32 4294901760, %v921_v22 }
 0x256   :  { %2221 = vmatprep.subr.bf16.mxu1 %v2465_v7  ;;  %v929_v25 = vand.u32 4294901760, %v928_v23  ;;  %v3087_v1 = vand.u32 4294901760, %v2852_v12  ;;  %v963_v34 = vsub.f32 %v2846_v13, %v3088_v10  ;;  %v2273_v8 = vpack.c.bf16 %v2852_v12, %v2846_v13 }
 0x257   :  { %2381 = verf.f32 %v729_v46  ;;  %v864_v46 = vand.u32 4294901760, %v2811_v28 }
 0x258   :  { %v2240_v48 = vpack.c.bf16 %v929_v25, %v922_v24  ;;  %v970_v35 = vsub.f32 %v2852_v12, %v3087_v1  ;;  %v964_v22 = vand.u32 4294901760, %v963_v34  ;;  %v2252_v25 = vpack.c.bf16 %v2813_v33, %v2811_v28 }
 0x259   :  { %2223 = vmatpush3.bf16.msra.mxu1 %v2855_v17 }
 0x25a   :  { %2224 = vmatprep.subr.bf16.mxu1 %v2465_v7  ;;  %v971_v23 = vand.u32 4294901760, %v970_v35 }
 0x25c   :  { %v2249_v24 = vpack.c.bf16 %v971_v23, %v964_v22 }
 0x25d   :  { %2226 = vmatpush3.bf16.msra.mxu1 %v2859_v31 }
 0x25e   :  { %2227 = vmatprep.subr.bf16.mxu1 %v2465_v7 }
 0x261   :  { %v2382_v49 = vpop.eup %2381 }
 0x262   :  { %v731_v51 = vadd.f32 1.0, %v2382_v49  ;;  %v871_v49 = vand.u32 4294901760, %v2813_v33 }
 0x264   :  { %v2796_v52 = vmul.f32 %v731_v51, %v728_v50  ;;  %v865_v50 = vsub.f32 %v2811_v28, %v864_v46  ;;  %v872_v51 = vsub.f32 %v2813_v33, %v871_v49  ;;  %v2306_v28 = vpack.c.bf16 %v899_v39, %v892_v38 }
 0x265   :  { %v3105_v33 = vand.u32 4294901760, %v2828_v40 }
 0x266   :  { %v750_v54 = vmul.f32 %v2796_v52, %v2796_v52  ;;  %v873_v55 = vand.u32 4294901760, %v872_v51  ;;  %v942_v51 = vsub.f32 %v2840_v36, %v3091_v61 }
 0x268   :  { %751 = vadd.xlane.f32.xlu0 %v750_v54  ;;  %v866_v54 = vand.u32 4294901760, %v865_v50  ;;  %v935_v50 = vsub.f32 %v2838_v32, %v3092_v60 }
 0x26a   :  { %v2874_v59 = vpack.c.bf16 %v873_v55, %v866_v54  ;;  %v936_v54 = vand.u32 4294901760, %v935_v50  ;;  %v943_v55 = vand.u32 4294901760, %v942_v51  ;;  %v2255_v50 = vpack.c.bf16 %v2817_v43, %v2815_v42 }
 0x26b   :  { %v2258_v51 = vpack.c.bf16 %v2822_v11, %v2820_v2  ;;  %v2309_v42 = vpack.c.bf16 %v3105_v33, %v906_v20  ;;  %v3106_v43 = vand.u32 4294901760, %v2834_v30  ;;  %v3108_v2 = vand.u32 4294901760, %v2838_v32 }
 0x26c   :  { %v2243_v26 = vpack.c.bf16 %v943_v55, %v936_v54  ;;  %v2261_v54 = vpack.c.bf16 %v2828_v40, %v2826_v18  ;;  %v2264_v55 = vpack.c.bf16 %v2836_v3, %v2834_v30  ;;  %v3109_v11 = vand.u32 4294901760, %v2840_v36 }
 0x26d   :  { %v3110_v18 = vand.u32 4294901760, %v2842_v4  ;;  %v3111_v40 = vand.u32 4294901760, %v2844_v47  ;;  %v3112_v30 = vand.u32 4294901760, %v2846_v13 }
 0x2f5   :  { %v752_v9 = vpop.xlane.xlu0 %751 }
 0x2f6   :  { %2383 = vrsqrt.f32 %v752_v9  ;;  %vm755_vm3 = vcmp.eq.f32.partialorder %v752_v9, inf  ;;  %v758_v22 = vand.u32 2147483648, %v752_v9  ;;  %vm757_vm4 = vcmp.eq.f32.partialorder %v752_v9, 0.0 }
 0x300   :  { %v2384_v34 = vpop.eup %2383 }
 0x301   :  { %v754_v35 = vmul.f32 %v2384_v34, %v752_v9 }
 0x303   :  { %v756_v23 = vsel %vm755_vm3, %v752_v9, %v754_v35 }
 0x304   :  { %v759_v1 = vsel %vm757_vm4, %v758_v22, %v756_v23 }
 0x305   :  { %v760_v10 = vadd.f32 0.0001, %v759_v1 }
 0x307   :  { %2385 = vrcp.f32 %v760_v10 }
 0x311   :  { %v2386_v21 = vpop.eup %2385 }
 0x312   :  { %v763_v15 = vmul.f32 %v2386_v21, %v2796_v52  ;;  %v2300_v52 = vpack.c.bf16 %v871_v49, %v864_v46  ;;  %v3107_v46 = vand.u32 4294901760, %v2836_v3  ;;  %v3113_v3 = vand.u32 4294901760, %v2852_v12 }
 0x314   :  { %v2951_v61 = vand.u32 4294901760, %v763_v15  ;;  %v2312_v49 = vpack.c.bf16 %v3107_v46, %v3106_v43  ;;  %v2321_v38 = vpack.c.bf16 %v3113_v3, %v3112_v30 }
 0x316   :  { %v852_v60 = vsub.f32 %v763_v15, %v2951_v61 }
 0x318   :  { %v853_v0 = vand.u32 4294901760, %v852_v60 }
 0x31a   :  { %v854_v41 = vsub.f32 %v852_v60, %v853_v0 }
 0x31c   :  { %v855_v62 = vand.u32 4294901760, %v854_v41 }
 0x31e   :  { %1882 = vmatmul.mubr.f32.vlgmr.msra.gmra.mrb[0].mxu1 %v855_v62 }
 0x31f   :  { %2229 = vmatpush3.bf16.msra.mxu1 %v2874_v59  ;;  %1916 = vmatprep.mubr.msk.f32.mxu1 %vm2466_vm0, %v2467_v57  ;;  %v2303_v59 = vpack.c.bf16 %v885_v58, %v878_v56  ;;  %v2315_v56 = vpack.c.bf16 %v3109_v11, %v3108_v2  ;;  %v2318_v58 = vpack.c.bf16 %v3111_v40, %v3110_v18 }
 0x320   :  { %2230 = vmatprep.subr.bf16.mxu1 %v2465_v7 }
 0x323   :  { %2232 = vmatpush3.bf16.msra.mxu1 %v2884_v44 }
 0x324   :  { %2233 = vmatprep.subr.bf16.mxu1 %v2465_v7 }
 0x327   :  { %2235 = vmatpush3.bf16.msra.mxu1 %v2894_v63 }
 0x328   :  { %2236 = vmatprep.subr.bf16.mxu1 %v2465_v7 }
 0x32b   :  { %2238 = vmatpush3.bf16.msra.mxu1 %v2237_v5 }
 0x32c   :  { %2239 = vmatprep.subr.bf16.mxu1 %v2465_v7 }
 0x32f   :  { %2241 = vmatpush3.bf16.msra.mxu1 %v2240_v48 }
 0x330   :  { %2242 = vmatprep.subr.bf16.mxu1 %v2465_v7 }
 0x333   :  { %2244 = vmatpush3.bf16.msra.mxu1 %v2243_v26 }
 0x334   :  { %2245 = vmatprep.subr.bf16.mxu1 %v2465_v7 }
 0x337   :  { %2247 = vmatpush3.bf16.msra.mxu1 %v2246_v19 }
 0x338   :  { %2248 = vmatprep.subr.bf16.mxu1 %v2465_v7 }
 0x33b   :  { %2250 = vmatpush3.bf16.msra.mxu1 %v2249_v24 }
 0x33c   :  { %2251 = vmatprep.subr.bf16.mxu1 %v2465_v7 }
 0x33e   :  { %1917 = vmatmul.mubr.f32.vlgmr.msra.gmra.mrb[0].mxu1 %v2951_v61 }
 0x33f   :  { %2253 = vmatpush3.bf16.msra.mxu1 %v2252_v25  ;;  %1951 = vmatprep.mubr.msk.f32.mxu1 %vm2466_vm0, %v2467_v57 }
 0x340   :  { %2254 = vmatprep.subr.bf16.mxu1 %v2465_v7 }
 0x343   :  { %2256 = vmatpush3.bf16.msra.mxu1 %v2255_v50 }
 0x344   :  { %2257 = vmatprep.subr.bf16.mxu1 %v2465_v7 }
 0x347   :  { %2259 = vmatpush3.bf16.msra.mxu1 %v2258_v51 }
 0x348   :  { %2260 = vmatprep.subr.bf16.mxu1 %v2465_v7 }
 0x34b   :  { %2262 = vmatpush3.bf16.msra.mxu1 %v2261_v54 }
 0x34c   :  { %2263 = vmatprep.subr.bf16.mxu1 %v2465_v7 }
 0x34f   :  { %2265 = vmatpush3.bf16.msra.mxu1 %v2264_v55 }
 0x350   :  { %2266 = vmatprep.subr.bf16.mxu1 %v2465_v7 }
 0x353   :  { %2268 = vmatpush3.bf16.msra.mxu1 %v2267_v27 }
 0x354   :  { %2269 = vmatprep.subr.bf16.mxu1 %v2465_v7 }
 0x357   :  { %2271 = vmatpush3.bf16.msra.mxu1 %v2270_v45 }
 0x358   :  { %2272 = vmatprep.subr.bf16.mxu1 %v2465_v7 }
 0x35b   :  { %2274 = vmatpush3.bf16.msra.mxu1 %v2273_v8 }
 0x35c   :  { %2275 = vmatprep.subr.bf16.mxu1 %v2465_v7 }
 0x35e   :  { %1952 = vmatmul.mubr.f32.vlgmr.msra.gmra.mrb[0].mxu1 %v852_v60 }
 0x35f   :  { %2277 = vmatpush3.bf16.msra.mxu1 %v2800_v14  ;;  %1986 = vmatprep.mubr.msk.f32.mxu1 %vm2466_vm0, %v2467_v57 }
 0x360   :  { %2278 = vmatprep.subr.bf16.mxu1 %v2465_v7 }
 0x363   :  { %2280 = vmatpush3.bf16.msra.mxu1 %v2804_v37 }
 0x364   :  { %2281 = vmatprep.subr.bf16.mxu1 %v2465_v7 }
 0x367   :  { %2283 = vmatpush3.bf16.msra.mxu1 %v2808_v53 }
 0x368   :  { %2284 = vmatprep.subr.bf16.mxu1 %v2465_v7 }
 0x36b   :  { %2286 = vmatpush3.bf16.msra.mxu1 %v2824_v16 }
 0x36c   :  { %2287 = vmatprep.subr.bf16.mxu1 %v2465_v7 }
 0x36f   :  { %2289 = vmatpush3.bf16.msra.mxu1 %v2832_v29 }
 0x370   :  { %2290 = vmatprep.subr.bf16.mxu1 %v2465_v7 }
 0x373   :  { %2292 = vmatpush3.bf16.msra.mxu1 %v2849_v6 }
 0x374   :  { %2293 = vmatprep.subr.bf16.mxu1 %v2465_v7 }
 0x377   :  { %2295 = vmatpush3.bf16.msra.mxu1 %v2855_v17 }
 0x378   :  { %2296 = vmatprep.subr.bf16.mxu1 %v2465_v7 }
 0x37b   :  { %2298 = vmatpush3.bf16.msra.mxu1 %v2859_v31 }
 0x37c   :  { %2299 = vmatprep.subr.bf16.mxu1 %v2465_v7 }
 0x37e   :  { %1987 = vmatmul.mubr.f32.vlgmr.msra.gmra.mrb[0].mxu1 %v853_v0 }
 0x37f   :  { %2301 = vmatpush3.bf16.msra.mxu1 %v2300_v52  ;;  %2021 = vmatprep.mubr.msk.f32.mxu1 %vm2466_vm0, %v2467_v57 }
 0x380   :  { %2302 = vmatprep.subr.bf16.mxu1 %v2465_v7 }
 0x383   :  { %2304 = vmatpush3.bf16.msra.mxu1 %v2303_v59 }
 0x384   :  { %2305 = vmatprep.subr.bf16.mxu1 %v2465_v7 }
 0x387   :  { %2307 = vmatpush3.bf16.msra.mxu1 %v2306_v28 }
 0x388   :  { %2308 = vmatprep.subr.bf16.mxu1 %v2465_v7 }
 0x38b   :  { %2310 = vmatpush3.bf16.msra.mxu1 %v2309_v42 }
 0x38c   :  { %2311 = vmatprep.subr.bf16.mxu1 %v2465_v7 }
 0x38f   :  { %2313 = vmatpush3.bf16.msra.mxu1 %v2312_v49 }
 0x390   :  { %2314 = vmatprep.subr.bf16.mxu1 %v2465_v7 }
 0x393   :  { %2316 = vmatpush3.bf16.msra.mxu1 %v2315_v56 }
 0x394   :  { %2317 = vmatprep.subr.bf16.mxu1 %v2465_v7 }
 0x397   :  { %2319 = vmatpush3.bf16.msra.mxu1 %v2318_v58 }
 0x398   :  { %2320 = vmatprep.subr.bf16.mxu1 %v2465_v7 }
 0x39b   :  { %2322 = vmatpush3.bf16.msra.mxu1 %v2321_v38 }
 0x39c   :  { %2323 = vmatprep.subr.bf16.mxu1 %v2465_v7 }
 0x39e   :  { %2022 = vmatmul.mubr.f32.vlgmr.msra.gmra.mrb[0].mxu1 %v2951_v61 }
 0x39f   :  { %2325 = vmatpush3.bf16.msra.mxu1 %v2800_v14  ;;  %2056 = vmatprep.mubr.msk.f32.mxu1 %vm2466_vm0, %v2467_v57  ;;  %v1434_v57 = vld [vmem:[%s3076_s4] ss:$0 sm:$0xff] }
 0x3a0   :  { %2326 = vmatprep.subr.bf16.mxu1 %v2465_v7 }
 0x3a3   :  { %2328 = vmatpush3.bf16.msra.mxu1 %v2804_v37 }
 0x3a4   :  { %2329 = vmatprep.subr.bf16.mxu1 %v2465_v7 }
 0x3a7   :  { %2331 = vmatpush3.bf16.msra.mxu1 %v2808_v53 }
 0x3a8   :  { %2332 = vmatprep.subr.bf16.mxu1 %v2465_v7 }
 0x3ab   :  { %2334 = vmatpush3.bf16.msra.mxu1 %v2824_v16 }
 0x3ac   :  { %2335 = vmatprep.subr.bf16.mxu1 %v2465_v7 }
 0x3af   :  { %2337 = vmatpush3.bf16.msra.mxu1 %v2832_v29 }
 0x3b0   :  { %2338 = vmatprep.subr.bf16.mxu1 %v2465_v7 }
 0x3b3   :  { %2340 = vmatpush3.bf16.msra.mxu1 %v2849_v6 }
 0x3b4   :  { %2341 = vmatprep.subr.bf16.mxu1 %v2465_v7 }
 0x3b7   :  { %2343 = vmatpush3.bf16.msra.mxu1 %v2855_v17 }
 0x3b8   :  { %2344 = vmatprep.subr.bf16.mxu1 %v2465_v7 }
 0x3bb   :  { %2346 = vmatpush3.bf16.msra.mxu1 %v2859_v31 }
 0x3be   :  { %2057 = vmatmul.mubr.f32.vlgmr.msra.gmra.mrb[0].mxu1 %v2951_v61 }
 0x491   :  { %v1407_v14 = vpop.f32.mrb[0].mxu1 }
 0x492   :  { %v2348_v37 = vadd.f32 %v1434_v57, %v1407_v14  ;;  %v2058_v53 = vpop.f32.mrb[1].mxu1 }
 0x494   :  { %v1412_v16 = vmul.f32 0.70710677, %v2348_v37  ;;  %v1411_v32 = vmul.f32 0.5, %v2348_v37 }
 0x496   :  { %2387 = verf.f32 %v1412_v16 }
 0x4a0   :  { %v2388_v29 = vpop.eup %2387 }
 0x4a1   :  { %v1414_v36 = vadd.f32 1.0, %v2388_v29 }
 0x4a3   :  { %v1415_v4 = vmul.f32 %v1414_v36, %v1411_v32 }
 0x4a5   :  { %1416 = vst [vmem:[#allocation7] sm:$0xff] %v1415_v4 }
 0x4a6   :  { %2444 = shalt.err (!%p2441_p6)
}
 0x4a7   :  { %s2445_s25 = scalar_lea.hbm %s3077_s5, 128 }
 0x4a8   :  { %p2446_p7 = scmp.ne.s32.totalorder %s3077_s5, %s2445_s25  ;;  %p2449_p8 = scmp.lt.u32.totalorder %s2445_s25, %s3077_s5 }
 0x4aa   :  { %p2451_p9 = pnand %p2449_p8, %p2446_p7 }
 0x4ac   :  { %2454 = shalt.err (!%p2451_p9)
}
 0x4ad   :  { %1426 = dma.vmem_to_hbm [thread:$0]  %s1424_s22, 128, %s3077_s5, [#allocation4]  }
 0x4ae   :  { %2459 = dma.done.wait [#allocation4], 128  }
 0x4af   :  { %2460 = vsyncadd [#allocation4], 4294967168 }
 0x4b0   :  { %1430 = vsyncpa [#allocation3], 1 }
 0x4b1   :  { %1431 = vsyncpa [#allocation6], 1 }
 0x4b2   :  { %1432 = vsyncpa [#allocation4], 1 }

</bundles_post_ra>
